<compile_context>
chip_gen: v7x
topology: tpu7x:2x2x1
jax: 0.10.0
libtpu: 0.0.40
codegen_flags: <defaults>
</compile_context>

<pallas_src>
import functools

import jax
import jax.numpy as jnp
from jax import lax
from jax.experimental import pallas as pl
from jax.experimental.pallas import tpu as pltpu

_LANE = 128


# ----------------------------------------------------------------------------
# Hardware-aware sizing helpers
# ----------------------------------------------------------------------------
def _round_up(v, mult):
    return ((v + mult - 1) // mult) * mult


def _vmem_capacity_bytes():
    """Physical VMEM per TensorCore; conservative fallback if unqueryable."""
    try:
        v = int(pltpu.get_tpu_info().vmem_capacity_bytes)
        if v > 0:
            return v
    except Exception:
        pass
    return 64 << 20  # v7x per-TC VMEM; safe lower bound for v5e/v6e too


def _num_tensorcores():
    """Best-effort TensorCore-per-chip count (2 on v7x, 1 on v5e/v6e)."""
    try:
        info = pltpu.get_tpu_info()
        for attr in ("num_cores", "core_count", "num_tensorcores",
                     "tensor_cores", "cores_per_chip"):
            v = getattr(info, attr, None)
            if isinstance(v, int) and v >= 1:
                return max(1, min(int(v), 2))
    except Exception:
        pass
    return 1


def _choose_block_k(m, n, itemsize, *, nc=1, block_k=None):
    """Pick the lane-aligned K tile and the zero-padded m.

    Biggest bk such that the double-buffered (n, bk) f32 slabs stay within
    ~50% of physical VMEM (generation-aware), capped at one full per-core
    chunk.  m is padded up so nc * bk divides it exactly.
    """
    if block_k is not None:
        bk = _round_up(int(block_k), _LANE)
    else:
        cap = _vmem_capacity_bytes()
        # Reserve room for the f32 accumulator, the resident (n, n) target and
        # compiler scratch; the rest feeds the double-buffered feature slabs.
        input_budget = max(cap // 2 - 4 * n * n * 4 - (2 << 20), 1 << 20)
        bk_budget = max(_LANE, (input_budget // (2 * n * itemsize)) // _LANE * _LANE)
        bk_cap = _round_up((m + nc - 1) // nc, _LANE)
        bk = max(_LANE, min(bk_budget, bk_cap))
    m_pad = _round_up(m, nc * bk)
    return bk, m_pad


def _vmem_limit_bytes(n, bk, itemsize):
    need = 2 * n * bk * itemsize + 3 * n * n * 4 + (4 << 20)
    cap = _vmem_capacity_bytes()
    return int(min(max(need, 16 << 20), max(cap - (8 << 20), 16 << 20)))


def _prepare_features(feats, nc, block_k):
    """Zero-pad the (n, m) f32 feature slab so nc * bk divides m exactly."""
    n, m = feats.shape
    bk, m_pad = _choose_block_k(m, n, 4, nc=nc, block_k=block_k)
    if m_pad != m:
        # Zero columns contribute nothing to F @ F^T -> numerically free.
        feats = jnp.pad(feats, ((0, 0), (0, m_pad - m)))
    return feats, bk, m_pad


# ----------------------------------------------------------------------------
# Kernel 1: partial Gram matrices (one per core shard)
#   partials[c] = (F_c @ F_c^T) / (a*b*c*d)   with F_c the c-th K chunk
# ----------------------------------------------------------------------------
def _gram_partial_kernel(f_ref, g_ref, acc_ref, *, inv_norm, use_bf16, precision):
    k = pl.program_id(1)

    @pl.when(k == 0)
    def _():
        acc_ref[...] = jnp.zeros_like(acc_ref)

    f = f_ref[...]                                        # (n, bk) f32 from HBM
    if use_bf16:
        f = f.astype(jnp.bfloat16)                        # in-kernel cast: no extra HBM pass
    # Contract the last axis of both operands (A @ A^T); no F^T materialization.
    acc_ref[...] += lax.dot_general(
        f, f, dimension_numbers=(((1,), (1,)), ((), ())),
        preferred_element_type=jnp.float32, precision=precision)

    @pl.when(k == pl.num_programs(1) - 1)
    def _():
        g_ref[...] = acc_ref[...] * inv_norm


def _gram_partial_call(feats, norm, *, n, bk, nc, use_bf16, precision=None):
    m_pad = feats.shape[1]
    kpc = m_pad // (nc * bk)            # K blocks handled by each core shard

    def feat_index_map(c, k):
        return (0, c * kpc + k)

    kernel = functools.partial(
        _gram_partial_kernel, inv_norm=1.0 / norm,
        use_bf16=use_bf16, precision=precision)

    return pl.pallas_call(
        kernel,
        out_shape=jax.ShapeDtypeStruct((nc, n, n), jnp.float32),
        grid_spec=pltpu.PrefetchScalarGridSpec(
            num_scalar_prefetch=0,
            grid=(nc, kpc),
            in_specs=[pl.BlockSpec((n, bk), feat_index_map)],
            out_specs=pl.BlockSpec((None, n, n), lambda c, k: (c, 0, 0)),
            scratch_shapes=[pltpu.VMEM((n, n), jnp.float32)],
        ),
        compiler_params=pltpu.CompilerParams(
            dimension_semantics=("parallel", "arbitrary"),
            vmem_limit_bytes=_vmem_limit_bytes(n, bk, 4),
        ),
        cost_estimate=pl.CostEstimate(
            flops=2 * n * n * m_pad, transcendentals=0,
            bytes_accessed=n * m_pad * 4 + nc * n * n * 4),
    )(feats)


def gram_matrix(x, *, use_bf16=True, block_k=None, mxu_precision=None):
    """x: (a, b, c, d) -> Gram matrix (a*b, a*b) in f32, normalized by a*b*c*d."""
    a, b, c, d = x.shape
    n, m = a * b, c * d
    feats = x.reshape(n, m).astype(jnp.float32)
    feats, bk, _ = _prepare_features(feats, 1, block_k)
    g = _gram_partial_call(feats, float(a * b * c * d), n=n, bk=bk, nc=1,
                           use_bf16=use_bf16, precision=mxu_precision)
    return g[0]


# ----------------------------------------------------------------------------
# Kernel 2: fused forward hot path (single-core K-tiled reduction)
#   G     = (F @ F^T) / (a*b*c*d)          (accumulated over K tiles)
#   loss  = mean((G - weighted_target)^2)  (epilogue on the last K step)
# ----------------------------------------------------------------------------
def _style_loss_kernel(f_ref, wt_ref, loss_ref, acc_ref, *,
                       inv_norm, inv_nn, use_bf16, precision):
    k = pl.program_id(0)

    @pl.when(k == 0)
    def _():
        acc_ref[...] = jnp.zeros_like(acc_ref)

    f = f_ref[...]                                        # (n, bk) f32 from HBM
    if use_bf16:
        f = f.astype(jnp.bfloat16)
    acc_ref[...] += lax.dot_general(
        f, f, dimension_numbers=(((1,), (1,)), ((), ())),
        preferred_element_type=jnp.float32, precision=precision)

    @pl.when(k == pl.num_programs(0) - 1)
    def _():
        diff = acc_ref[...] * inv_norm - wt_ref[...]      # f32 epilogue
        loss_ref[0, 0] = jnp.sum(diff * diff) * inv_nn


def _style_loss_fused_call(feats, weighted_target, norm, *, n, bk,
                           use_bf16, precision=None):
    m_pad = feats.shape[1]
    grid_k = m_pad // bk

    kernel = functools.partial(
        _style_loss_kernel, inv_norm=1.0 / norm, inv_nn=1.0 / float(n * n),
        use_bf16=use_bf16, precision=precision)

    return pl.pallas_call(
        kernel,
        out_shape=jax.ShapeDtypeStruct((1, 1), jnp.float32),
        grid_spec=pltpu.PrefetchScalarGridSpec(
            num_scalar_prefetch=0,
            grid=(grid_k,),
            in_specs=[
                pl.BlockSpec((n, bk), lambda k: (0, k)),   # K-tiled features
                # Constant resident operand; for very large n this could use
                # pipeline_mode=pl.Buffered(1) to drop its second VMEM buffer.
                pl.BlockSpec((n, n), lambda k: (0, 0)),
            ],
            out_specs=pl.BlockSpec(memory_space=pltpu.SMEM),
            scratch_shapes=[pltpu.VMEM((n, n), jnp.float32)],
        ),
        compiler_params=pltpu.CompilerParams(
            dimension_semantics=("arbitrary",),
            vmem_limit_bytes=_vmem_limit_bytes(n, bk, 4),
        ),
        cost_estimate=pl.CostEstimate(
            flops=2 * n * n * m_pad + 3 * n * n, transcendentals=0,
            bytes_accessed=n * m_pad * 4 + n * n * 4 + 4),
    )(feats, weighted_target)


# ----------------------------------------------------------------------------
# Module wrapper (mirrors the PyTorch StyleLoss semantics)
# ----------------------------------------------------------------------------
class StyleLoss:
    def __init__(self, target_feature, *, use_bf16=True, block_k=None,
                 core_shards=None, mxu_precision=None):
        self.use_bf16 = use_bf16
        self.block_k = block_k
        self.mxu_precision = mxu_precision
        self.core_shards = (core_shards if core_shards is not None
                            else _num_tensorcores())
        # target Gram (detached constant in PyTorch) via the Pallas gram kernel
        self.target = gram_matrix(target_feature, use_bf16=use_bf16,
                                  block_k=block_k, mxu_precision=mxu_precision)
        n = self.target.shape[-1]
        # torch.linspace(2, 0, steps=n)
        self.weight = jnp.linspace(2.0, 0.0, n, dtype=jnp.float32)
        # Constant across forward calls: hoist target * weight out of the kernel.
        self.weighted_target = self.target * self.weight.reshape(1, n)
        self.loss = None

    def forward(self, x):
        a, b, c, d = x.shape
        n, m = a * b, c * d
        norm = float(a * b * c * d)
        # f32 straight into the kernel; bf16 cast (if any) happens in-kernel so
        # the features are read from HBM exactly once.
        feats = x.reshape(n, m).astype(jnp.float32)
        nc = max(1, int(self.core_shards))
        feats, bk, _ = _prepare_features(feats, nc, self.block_k)

        if nc == 1:
            # Fused kernel: Gram accumulation + MSE epilogue, scalar out in SMEM.
            loss = _style_loss_fused_call(
                feats, self.weighted_target, norm, n=n, bk=bk,
                use_bf16=self.use_bf16, precision=self.mxu_precision)
            self.loss = loss[0, 0]
        else:
            # v7x path: K reduction sharded across TensorCores; sum the per-core
            # partial Grams and do the tiny (n, n) MSE epilogue in the wrapper.
            partials = _gram_partial_call(
                feats, norm, n=n, bk=bk, nc=nc,
                use_bf16=self.use_bf16, precision=self.mxu_precision)
            g = jnp.sum(partials, axis=0)
            self.loss = jnp.mean((g - self.weighted_target) ** 2)
        return x                                   # pass-through, like nn.Module

    __call__ = forward


# ----------------------------------------------------------------------------
# Pure-JAX reference for sanity checking
# ----------------------------------------------------------------------------
def _ref_gram(x):
    a, b, c, d = x.shape
    f = x.reshape(a * b, c * d).astype(jnp.float32)
    return (f @ f.T) / float(a * b * c * d)


def _ref_loss(x, target, weight):
    g = _ref_gram(x)
    wt = target * weight.reshape(1, -1)
    return jnp.mean((g - wt) ** 2)


if __name__ == "__main__":
    key = jax.random.PRNGKey(0)
    k1, k2, k3, k4, k5, k6 = jax.random.split(key, 6)

    # NCHW = (2, 4, 16, 16)  ->  n = 8, m = 256
    target_feature = jax.random.normal(k1, (2, 4, 16, 16), dtype=jnp.float32)
    x = jax.random.normal(k2, (2, 4, 16, 16), dtype=jnp.float32)
    ref_target = _ref_gram(target_feature)

    # 1) f32 MXU-input path with forced block_k=128 (2 K steps): exercises the
    #    accumulator init / epilogue pl.when path of the fused kernel.
    mod_f32 = StyleLoss(target_feature, use_bf16=False, block_k=128)
    out = mod_f32(x)
    jax.block_until_ready(out)
    loss_f32 = jax.block_until_ready(mod_f32.loss)
    ref_loss = _ref_loss(x, ref_target, mod_f32.weight)
    assert out.shape == x.shape and bool(jnp.allclose(out, x))
    assert bool(jnp.allclose(mod_f32.target, ref_target, rtol=1e-2, atol=1e-3)), (
        mod_f32.target, ref_target)
    assert bool(jnp.allclose(loss_f32, ref_loss, rtol=1e-2, atol=1e-3)), (
        loss_f32, ref_loss)

    # 2) default bf16-MXU path, auto tile (single full-m K step at this size).
    mod_bf16 = StyleLoss(target_feature)
    mod_bf16(x)
    loss_bf16 = jax.block_until_ready(mod_bf16.loss)
    assert bool(jnp.allclose(loss_bf16, ref_loss, rtol=5e-2, atol=1e-3)), (
        loss_bf16, ref_loss)

    # 3) larger spatial map (m = 1024) with block_k=256 -> 4 K steps.
    t_big = jax.random.normal(k3, (2, 4, 32, 32), dtype=jnp.float32)
    x_big = jax.random.normal(k4, (2, 4, 32, 32), dtype=jnp.float32)
    mod_big = StyleLoss(t_big, use_bf16=False, block_k=256)
    mod_big(x_big)
    loss_big = jax.block_until_ready(mod_big.loss)
    ref_big = _ref_loss(x_big, _ref_gram(t_big), mod_big.weight)
    assert bool(jnp.allclose(loss_big, ref_big, rtol=1e-2, atol=1e-3)), (
        loss_big, ref_big)

    # 4) explicit 2-way core-sharded K reduction (the v7x path).  On a 1-TC
    #    chip the "parallel" axis just runs serially, so the result must match.
    mod_2tc = StyleLoss(t_big, use_bf16=False, block_k=256, core_shards=2)
    mod_2tc(x_big)
    loss_2tc = jax.block_until_ready(mod_2tc.loss)
    assert bool(jnp.allclose(loss_2tc, ref_big, rtol=1e-2, atol=1e-3)), (
        loss_2tc, ref_big)

    # 5) non-128-aligned m (c*d = 144): zero-padded to a lane multiple in the
    #    wrapper; padding must not change the Gram / loss.
    t_odd = jax.random.normal(k5, (1, 8, 12, 12), dtype=jnp.float32)
    x_odd = jax.random.normal(k6, (1, 8, 12, 12), dtype=jnp.float32)
    mod_odd = StyleLoss(t_odd, use_bf16=False)
    mod_odd(x_odd)
    loss_odd = jax.block_until_ready(mod_odd.loss)
    ref_odd = _ref_loss(x_odd, _ref_gram(t_odd), mod_odd.weight)
    assert bool(jnp.allclose(loss_odd, ref_odd, rtol=1e-2, atol=1e-3)), (
        loss_odd, ref_odd)

    print("KERNEL_OK")
</pallas_src>

<mosaic_0001>
module attributes {stable_mosaic.version = 11 : i64} {
  func.func @_gram_partial_kernel(%arg0: i32, %arg1: i32, %arg2: memref<8x128xf32, #tpu.memory_space<vmem>>, %arg3: memref<1x8x8xf32, #tpu.memory_space<vmem>>, %arg4: memref<8x8xf32, #tpu.memory_space<vmem>>) attributes {dimension_semantics = [#tpu.dimension_semantics<parallel>, #tpu.dimension_semantics<arbitrary>], iteration_bounds = array<i64: 1, 2>, scalar_prefetch = 0 : i64, scratch_operands = 1 : i64, tpu.core_type = #tpu.core_type<tc>, window_params = [{transform_indices = @transform_0, window_bounds = array<i64: 8, 128>}, {transform_indices = @transform_1, window_bounds = array<i64: 1, 8, 8>}]} {
    %c0_i32 = arith.constant 0 : i32
    %0 = arith.cmpi eq, %arg1, %c0_i32 : i32
    %1 = arith.extui %0 : i1 to i32
    %c0_i32_0 = arith.constant 0 : i32
    %2 = arith.cmpi ne, %1, %c0_i32_0 : i32
    scf.if %2 {
      %cst_7 = arith.constant 0.000000e+00 : f32
      %11 = vector.broadcast %cst_7 : f32 to vector<8x8xf32>
      %c0_8 = arith.constant 0 : index
      %c0_9 = arith.constant 0 : index
      %12 = vector.load %arg4[%c0_8, %c0_9] : memref<8x8xf32, #tpu.memory_space<vmem>>, vector<8x8xf32>
      tpu.vector_store %arg4[%c0_8, %c0_9], %11 {strides = array<i32>} : memref<8x8xf32, #tpu.memory_space<vmem>>, vector<8x8xf32>,
    } else {
    }
    %c0 = arith.constant 0 : index
    %c0_1 = arith.constant 0 : index
    %3 = vector.load %arg2[%c0, %c0_1] : memref<8x128xf32, #tpu.memory_space<vmem>>, vector<8x128xf32>
    %c0_2 = arith.constant 0 : index
    %c0_3 = arith.constant 0 : index
    %4 = vector.load %arg4[%c0_2, %c0_3] : memref<8x8xf32, #tpu.memory_space<vmem>>, vector<8x8xf32>
    %cst = arith.constant dense<0.000000e+00> : vector<8x8xf32>
    %5 = tpu.matmul %3, %3, %cst {dimension_numbers = #tpu.dot_dimension_numbers<[1], [1], [0], [0], [0, 0, 1, 0], [], []>} : vector<8x128xf32>, vector<8x128xf32>, vector<8x8xf32> -> vector<8x8xf32>
    %6 = arith.addf %4, %5 : vector<8x8xf32>
    %c0_4 = arith.constant 0 : index
    %c0_5 = arith.constant 0 : index
    %7 = vector.load %arg4[%c0_4, %c0_5] : memref<8x8xf32, #tpu.memory_space<vmem>>, vector<8x8xf32>
    tpu.vector_store %arg4[%c0_4, %c0_5], %6 {strides = array<i32>} : memref<8x8xf32, #tpu.memory_space<vmem>>, vector<8x8xf32>,
    %c1_i32 = arith.constant 1 : i32
    %8 = arith.cmpi eq, %arg1, %c1_i32 : i32
    %9 = arith.extui %8 : i1 to i32
    %c0_i32_6 = arith.constant 0 : i32
    %10 = arith.cmpi ne, %9, %c0_i32_6 : i32
    scf.if %10 {
      %c0_7 = arith.constant 0 : index
      %c0_8 = arith.constant 0 : index
      %11 = vector.load %arg4[%c0_7, %c0_8] : memref<8x8xf32, #tpu.memory_space<vmem>>, vector<8x8xf32>
      %cst_9 = arith.constant 4.8828125E-4 : f32
      %12 = vector.broadcast %cst_9 : f32 to vector<8x8xf32>
      %13 = arith.mulf %11, %12 : vector<8x8xf32>
      %c0_10 = arith.constant 0 : index
      %c0_11 = arith.constant 0 : index
      %c0_12 = arith.constant 0 : index
      %14 = vector.load %arg3[%c0_10, %c0_11, %c0_12] : memref<1x8x8xf32, #tpu.memory_space<vmem>>, vector<1x8x8xf32>
      %15 = vector.shape_cast %14 : vector<1x8x8xf32> to vector<8x8xf32>
      %16 = vector.shape_cast %13 : vector<8x8xf32> to vector<1x8x8xf32>
      tpu.vector_store %arg3[%c0_10, %c0_11, %c0_12], %16 {strides = array<i32>} : memref<1x8x8xf32, #tpu.memory_space<vmem>>, vector<1x8x8xf32>,
    } else {
    }
    return
  }
  func.func @transform_0(%arg0: i32, %arg1: i32) -> (i32, i32) {
    %c2_i32 = arith.constant 2 : i32
    %0 = arith.muli %arg0, %c2_i32 : i32
    %1 = arith.addi %0, %arg1 : i32
    %c0_i32 = arith.constant 0 : i32
    %c0_i32_0 = arith.constant 0 : i32
    return %c0_i32, %1 : i32, i32
  }
  func.func @transform_1(%arg0: i32, %arg1: i32) -> (i32, i32, i32) {
    %c0_i32 = arith.constant 0 : i32
    %c0_i32_0 = arith.constant 0 : i32
    %c0_i32_1 = arith.constant 0 : i32
    return %arg0, %c0_i32, %c0_i32_0 : i32, i32, i32
  }
}

</mosaic_0001>

<bundles_post_ra>
// kernel: tpu_custom_call.1
= control target key start
LH: loop header
LB: loop body
LE: loop exit
PB: predicated region body
PF: predicated region fallthrough
CT: control target
= control target key end

     0   :  { %6 = vsyncpa [#allocation4], 0  ;;  %s669_s0 = inlined_call_operand.hbm [shape: f32[8,256], index: 0, kind: input, shape index: {}]   ;;  %s670_s1 = inlined_call_operand.hbm [shape: f32[1,8,8], index: 1, kind: output, shape index: {}]  }
   0x1   :  { %8 = vsyncpa [#allocation4 + $0x1], 0 }
   0x2   :  { %9 = vsyncpa [#allocation5], 0  ;;  %s517_s6 = smov 0   ;;  %s519_s7 = smov 0  }
   0x3   :  { %s521_s8 = smov 0   ;;  %s523_s9 = smov 0  }
   0x4   :  { %s525_s10 = smov 0   ;;  %s527_s11 = smov 0  }
   0x5 LB: > { %s305_s12 = sadd.s32 4294967295, %s500_s11   ;;  %s24_s13 = sadd.s32 1, %s496_s10  ;;  %s500_s11 = sphi %s527_s11, %s15_s11   ;;  %s496_s10 = sphi %s525_s10, %s681_s10   ;;  %s492_s9 = sphi %s523_s9, %s680_s9   ;;  %s488_s8 = sphi %s521_s8, %s679_s8   ;;  %s484_s7 = sphi %s519_s7, %s678_s7   ;;  %s480_s6 = sphi %s517_s6, %s677_s6  }
   0x6   : > { %p25_p0 = scmp.ge.s32.totalorder %s24_s13, 2  ;;  %s38_s14 = sadd.s32 1, %s488_s8 }
   0x7   : > { %p45_p1 = scmp.ne.s32.totalorder %s488_s8, %s484_s7  ;;  %p46_p2 = scmp.eq.s32.totalorder %s500_s11, 0 }
   0x8   : > { %s683_s13 = smov (%p25_p0, %s24_s13), 0  ;;  %p51_p4 = scmp.ne.s32.totalorder %s484_s7, %s480_s6 }
   0x9   : > { %p553_p3 = por %p46_p2, %p45_p1  ;;  %s35_s16 = ssub.s32 %s496_s10, %s683_s13 }
   0xa   : > { %p52_p5 = scmp.eq.s32.totalorder %s305_s12, 0  ;;  %p36_p6 = scmp.eq.s32.totalorder %s35_s16, 0 }
   0xb   : > { %p335_p8 = scmp.lt.s32.totalorder %s500_s11, 2  ;;  %s101_s19 = sand.u32 1, %s488_s8  }
   0xc   : > { %p562_p7 = por %p52_p5, %p51_p4  ;;  %s309_s20 = sshll.u32 %s496_s10, 7 }
   0xd   : > { %s568_s18 = scalar_select %p36_p6, %s488_s8, %s38_s14  }
   0xe   : > { %s308_s21 = sshll.u32 %s101_s19, 3  ;;  %s575_s24 = scalar_lea.hbm %s669_s0, %s309_s20 }
   0xf   : > { %s105_s25 = scalar_lea.vmem [#allocation3], %s308_s21  ;;  %p579_p9 = pnand %p335_p8, %p553_p3 }
  0x10   : > { %s114_s26 = sshll.u32 %s105_s25, 4  ;;  %s102_s28 = scalar_lea.sflag [#allocation4], %s101_s19  ;;  %s583_s26 = int_to_ptr.vmem [resolvable:$true] %s114_s26 }
  0x11   : > { %s390_s29 = scalar_lea.hbm %s575_s24, 128  ;;  %p392_p13 = pneg %p579_p9 }
  0x12   : > { %p391_p12 = scmp.ne.s32.totalorder %s575_s24, %s390_s29  ;;  %s395_s3 = scalar_lea.hbm %s669_s0, 256 }
  0x13   : > { %p396_p2 = scmp.lt.u32.totalorder %s575_s24, %s669_s0  ;;  %p397_p3 = scmp.lt.u32.totalorder %s395_s3, %s390_s29 }
  0x14   : > { %p393_p0 = pnand %p392_p13, %p391_p12  ;;  %p399_p5 = scmp.lt.u32.totalorder %s390_s29, %s575_s24 }
  0x15   : > { %p398_p4 = por %p397_p3, %p396_p2 }
  0x16   : > { %p394_p1 = pneg %p393_p0 }
  0x17   : > { %p400_p6 = por %p399_p5, %p398_p4 }
  0x19   : > { %p401_p8 = pnand %p400_p6, %p394_p1 }
  0x1b   : > { %404 = shalt.err (!%p401_p8)
}
  0x1c   : > { %s405_s6 = scalar_lea.vmem %s583_s26, 128  ;;  %s502_s14 = smov [#allocation3]  }
  0x1d   : > { %p406_p12 = scmp.ne.s32.totalorder %s583_s26, %s405_s6  ;;  %s410_s15 = sshll.u32 %s502_s14, 4  ;;  %s411_s15 = int_to_ptr.vmem [resolvable:$false] %s410_s15 }
  0x1e   : > { %s412_s16 = scalar_lea.vmem %s411_s15, 256  ;;  %p413_p11 = scmp.lt.s32.totalorder %s583_s26, %s411_s15 }
  0x1f   : > { %p408_p0 = pnand %p406_p12, %p392_p13  ;;  %p414_p2 = scmp.lt.s32.totalorder %s412_s16, %s405_s6 }
  0x21   : > { %p409_p10 = pneg %p408_p0  ;;  %p415_p3 = por %p414_p2, %p413_p11 }
  0x23   : > { %p416_p4 = pnand %p415_p3, %p409_p10 }
  0x25   : > { %419 = shalt.err (!%p416_p4)
}
  0x26   : > { %334 = dma.hbm_to_vmem [thread:$0]  (!%p579_p9), %s575_s24, 128, %s583_s26, %s102_s28  }
  0x27   : > { %p674_p1 = scmp.lt.s32.totalorder %s500_s11, 3  ;;  %p675_p5 = scmp.ge.s32.totalorder %s500_s11, 1 }
  0x29   : > { %p120_p13 = pnand %p675_p5, %p674_p1 }
  0x2a   : > { %s125_s19 = sand.u32 (!%p120_p13), 1, %s484_s7  }
  0x2b   : > { %123 = sbr.rel (%p120_p13) target bundleno = 315 (0x13b), region = 24  ;;  %s311_s20 = sshll.u32 (!%p120_p13), %s125_s19, 3 }
  0x2c   : > { %s126_s21 = scalar_lea.sflag (!%p120_p13), [#allocation4], %s125_s19  ;;  %s129_s22 = scalar_lea.vmem (!%p120_p13), [#allocation3], %s311_s20 }
  0x32   : > { %471 = dma.done.wait (%p562_p7), %s126_s21, 128  }
  0x33   : > { %473 = vsyncadd (%p562_p7), %s126_s21, 4294967168  ;;  %p312_p10 = scmp.ne.s32.totalorder %s492_s9, 0 }
  0x34   : > { %vm149_vm0 = vcmask (!%p312_p10), 64512   ;;  %v503_v0 = vmov (!%p312_p10), 0.0  }
  0x35   : > { %148 = sbr.rel (%p312_p10) target bundleno = 60 (0x3c), region = 32  ;;  %150 = vst.msk [vmem:[#allocation2] sm:$0xff] (!%p312_p10), %vm149_vm0, %v503_v0 }
  0x3c PF: > { %v151_v1 = vld [vmem:[%s129_s22] sm:$0xff]  ;;  %v504_v2 = vmov 0.0   ;;  %vm505_vm1 = vmmov 0   ;;  %v152_v3 = vld [vmem:[#allocation2] sm:$0xff]  ;;  %vm224_vm2 = vcmask 64512   ;;  %p313_p7 = scmp.ne.s32.totalorder %s492_s9, 1 }
  0x3d   : > { %320 = vmatprep.subr.mxu0 %v504_v2  ;;  %322 = vmatprep.mubr.msk.f32.mxu0 %vm505_vm1, %v504_v2 }
  0x3e   : > { %321 = vmatpush3.xpose.msra.mxu0 %v151_v1 }
  0x41   : > { %323 = vmatmul.mubr.f32.vlgmr.msra.gmra.mrb[0].mxu0 %v151_v1 }
 0x111   : > { %229 = sbr.rel (%p313_p7) target bundleno = 290 (0x122), region = 36 }
 0x114   : > { %v219_v4 = vpop.f32.mrb[0].mxu0 }
 0x115   : > { %v223_v5 = vadd.f32 %v219_v4, %v152_v3  ;;  %v324_v6 = vpop.f32.mrb[1].mxu0 }
 0x117   : > { %225 = vst.msk [vmem:[#allocation2] sm:$0xff] %vm224_vm2, %v223_v5 }
 0x11e   : > { %v230_v7 = vld [vmem:[#allocation2] sm:$0xff] }
 0x11f   : > { %v231_v8 = vmul.f32 0.00048828125, %v230_v7 }
 0x121   : > { %232 = vst.msk [vmem:[#allocation6] sm:$0xff] %vm224_vm2, %v231_v8 }
 0x122 PF: > { %p625_p9 = scmp.eq.s32.totalorder %s305_s12, 1  ;;  %s506_s23 = smov [#allocation6]  }
 0x123   : > { %s242_s24 = sshll.u32 %s506_s23, 4  ;;  %s243_s24 = int_to_ptr.vmem [resolvable:$true] %s242_s24 }
 0x124   : > { %s420_s25 = scalar_lea.vmem %s243_s24, 128  ;;  %p427_p12 = scmp.lt.s32.totalorder %s243_s24, %s243_s24 }
 0x125   : > { %p421_p11 = scmp.ne.s32.totalorder %s243_s24, %s420_s25  ;;  %p428_p0 = scmp.lt.s32.totalorder %s420_s25, %s420_s25 }
 0x127   : > { %p422_p6 = pnand %p421_p11, %p625_p9  ;;  %p429_p2 = por %p428_p0, %p427_p12 }
 0x129   : > { %p423_p8 = pneg %p422_p6 }
 0x12b   : > { %p430_p3 = pnand %p429_p2, %p423_p8 }
 0x12d   : > { %433 = shalt.err (!%p430_p3)
}
 0x12e   : > { %s434_s12 = scalar_lea.hbm %s670_s1, 128 }
 0x12f   : > { %p435_p4 = scmp.ne.s32.totalorder %s670_s1, %s434_s12  ;;  %p440_p13 = scmp.lt.u32.totalorder %s434_s12, %s670_s1 }
 0x131   : > { %p436_p1 = pnand %p435_p4, %p625_p9 }
 0x133   : > { %p437_p5 = pneg %p436_p1 }
 0x135   : > { %p442_p10 = pnand %p440_p13, %p437_p5 }
 0x137   : > { %445 = shalt.err (!%p442_p10)
}
 0x138   : > { %328 = dma.vmem_to_hbm [thread:$0]  (%p625_p9), %s243_s24, 128, %s670_s1, [#allocation5]  }
 0x139   : > { %475 = dma.done.wait (%p625_p9), [#allocation5], 128  }
 0x13a   : > { %477 = vsyncadd (%p625_p9), [#allocation5], 4294967168 }
 0x13b PF: > { %s15_s11 = sadd.s32 1, %s500_s11   ;;  %s677_s6 = smov %s484_s7 }
 0x13c   : > { %p12_p7 = scmp.ge.s32.totalorder %s15_s11, 4   ;;  %s678_s7 = smov %s488_s8 }
 0x13d   : > { %s679_s8 = smov %s568_s18  ;;  %s680_s9 = smov %s496_s10 }
 0x13e   : > { %s681_s10 = smov %s683_s13  ;;  %14 = sbr.rel (!%p12_p7) target bundleno = 5 (0x5), region = 70 }
 0x145   :  { %255 = vsyncpa [#allocation4], 1 }
 0x146   :  { %257 = vsyncpa [#allocation4 + $0x1], 1 }
 0x147   :  { %258 = vsyncpa [#allocation5], 1 }
 0x148   :  { %260 = vsyncpa [#allocation5 + $0x1], 1 }

</bundles_post_ra>
